<compile_context>
chip_gen: v5e
topology: v5e:2x2
jax: 0.10.0
libtpu: 0.0.40
codegen_flags: <defaults>
</compile_context>

<pallas_src>
import functools

import jax
import jax.numpy as jnp
from jax.experimental import pallas as pl
from jax.experimental.pallas import tpu as pltpu

LN_EPS = 1e-5  # torch.nn.LayerNorm default


def _round_up(x, m):
    return ((x + m - 1) // m) * m


def _layer_norm(h, gamma, beta):
    # Single-pass biased variance (matches torch.nn.LayerNorm).
    mu = jnp.mean(h, axis=-1, keepdims=True)
    msq = jnp.mean(h * h, axis=-1, keepdims=True)
    var = msq - mu * mu
    return (h - mu) * jax.lax.rsqrt(var + LN_EPS) * gamma + beta


def mlp_kernel(compute_dtype,
               x_ref,
               w1_ref, b1_ref, g1_ref, be1_ref,
               w2_ref, b2_ref, g2_ref, be2_ref,
               w3_ref, b3_ref,
               out_ref):
    x = x_ref[...].astype(compute_dtype)

    # ---- hidden layer 1: Linear -> ReLU -> LayerNorm (LN math in f32) ----
    h = jnp.dot(x, w1_ref[...].astype(compute_dtype),
                preferred_element_type=jnp.float32) + b1_ref[...]
    h = jnp.maximum(h, 0.0)
    h = _layer_norm(h, g1_ref[...], be1_ref[...])

    # ---- hidden layer 2: Linear -> ReLU -> LayerNorm ----
    h = jnp.dot(h.astype(compute_dtype), w2_ref[...].astype(compute_dtype),
                preferred_element_type=jnp.float32) + b2_ref[...]
    h = jnp.maximum(h, 0.0)
    h = _layer_norm(h, g2_ref[...], be2_ref[...])

    # ---- output layer: Linear to (lane-padded) output_dim ----
    o = jnp.dot(h.astype(compute_dtype), w3_ref[...].astype(compute_dtype),
                preferred_element_type=jnp.float32) + b3_ref[...]
    out_ref[...] = o.astype(out_ref.dtype)


def base_network_forward(x, params, output_dim, *, block_b=512,
                         compute_dtype=jnp.float32):
    """Full BaseNetwork forward in one pallas_call (batch-tiled grid)."""
    (w1, b1, g1, be1, w2, b2, g2, be2, w3, b3) = params
    B, in_dim = x.shape
    h2 = w2.shape[1]

    # --- lane-dense output: pad final layer columns to a multiple of 128 ---
    out_pad = _round_up(max(output_dim, 1), 128)
    if w3.shape[1] != out_pad:
        w3p = jnp.zeros((h2, out_pad), w3.dtype).at[:, :output_dim].set(w3)
        b3p = jnp.zeros((1, out_pad), b3.dtype).at[:, :output_dim].set(b3)
    else:
        w3p, b3p = w3, b3

    # --- batch tiling: pad B up to a multiple of the batch block (>= 8) ---
    bt = _round_up(min(block_b, _round_up(B, 8)), 8)
    B_pad = _round_up(B, bt)
    x_p = x if B_pad == B else jnp.zeros((B_pad, in_dim), x.dtype).at[:B].set(x)

    grid = (B_pad // bt,)

    def row_map(i):     # x / output tiles march over the batch axis
        return (i, 0)

    def fixed_map(i):   # weights / biases / LN params stay VMEM-resident
        return (0, 0)

    weight_args = (w1, b1, g1, be1, w2, b2, g2, be2, w3p, b3p)
    in_specs = [pl.BlockSpec((bt, in_dim), row_map)] + \
               [pl.BlockSpec(a.shape, fixed_map) for a in weight_args]

    out = pl.pallas_call(
        functools.partial(mlp_kernel, compute_dtype),
        out_shape=jax.ShapeDtypeStruct((B_pad, out_pad), jnp.float32),
        grid=grid,
        in_specs=in_specs,
        out_specs=pl.BlockSpec((bt, out_pad), row_map),
        compiler_params=pltpu.CompilerParams(
            dimension_semantics=("parallel",),
            vmem_limit_bytes=32 * 1024 * 1024,
        ),
    )(x_p, *weight_args)

    # Slice off batch padding and lane padding outside the kernel.
    return out[:B, :output_dim]


# ------------------------- parameter construction -------------------------

def xavier_uniform(key, fan_in, fan_out):
    # matches torch.nn.init.xavier_uniform_ (gain=1)
    limit = jnp.sqrt(6.0 / (fan_in + fan_out))
    return jax.random.uniform(key, (fan_in, fan_out), jnp.float32, -limit, limit)


def init_base_network_params(key, input_dim, output_dim, hidden_dims=(256, 256)):
    h1, h2 = hidden_dims
    k1, k2, k3 = jax.random.split(key, 3)
    w1 = xavier_uniform(k1, input_dim, h1)
    b1 = jnp.zeros((1, h1), jnp.float32)
    g1 = jnp.ones((1, h1), jnp.float32)
    be1 = jnp.zeros((1, h1), jnp.float32)
    w2 = xavier_uniform(k2, h1, h2)
    b2 = jnp.zeros((1, h2), jnp.float32)
    g2 = jnp.ones((1, h2), jnp.float32)
    be2 = jnp.zeros((1, h2), jnp.float32)
    w3 = xavier_uniform(k3, h2, output_dim)
    b3 = jnp.zeros((1, output_dim), jnp.float32)
    return (w1, b1, g1, be1, w2, b2, g2, be2, w3, b3)


def base_network_forward_ref(x, params):
    """Pure-JAX reference for correctness checking."""
    (w1, b1, g1, be1, w2, b2, g2, be2, w3, b3) = params
    h = jnp.maximum(x @ w1 + b1, 0.0)
    h = _layer_norm(h, g1, be1)
    h = jnp.maximum(h @ w2 + b2, 0.0)
    h = _layer_norm(h, g2, be2)
    return h @ w3 + b3


# TODO(synk): dropout (dropout_rate>0) and non-ReLU activations of BaseNetwork
# are not implemented; the defaults (relu, dropout_rate=0, use_layer_norm=True)
# are reproduced exactly.

if __name__ == "__main__":
    INPUT_DIM, OUTPUT_DIM = 16, 8
    key = jax.random.PRNGKey(0)
    pkey, skey1, skey2 = jax.random.split(key, 3)

    params = init_base_network_params(pkey, INPUT_DIM, OUTPUT_DIM)

    # Small-batch check (single grid step, batch padded 2 -> 8).
    x_small = jax.random.normal(skey1, (2, INPUT_DIM), jnp.float32)
    out_small = jax.block_until_ready(
        base_network_forward(x_small, params, OUTPUT_DIM))
    ref_small = base_network_forward_ref(x_small, params)
    assert out_small.shape == (2, OUTPUT_DIM)
    assert jnp.allclose(out_small, ref_small, atol=1e-4, rtol=1e-4)

    # Multi-step grid check (B=100, block_b=64 -> padded to 128, 2 grid steps).
    x_big = jax.random.normal(skey2, (100, INPUT_DIM), jnp.float32)
    out_big = jax.block_until_ready(
        base_network_forward(x_big, params, OUTPUT_DIM, block_b=64))
    ref_big = base_network_forward_ref(x_big, params)
    assert out_big.shape == (100, OUTPUT_DIM)
    assert jnp.allclose(out_big, ref_big, atol=1e-4, rtol=1e-4)

    print("KERNEL_OK")
</pallas_src>

<mosaic_0001>
module attributes {stable_mosaic.version = 11 : i64} {
  func.func @mlp_kernel(%arg0: i32, %arg1: memref<8x16xf32, #tpu.memory_space<vmem>>, %arg2: memref<16x256xf32, #tpu.memory_space<vmem>>, %arg3: memref<1x256xf32, #tpu.memory_space<vmem>>, %arg4: memref<1x256xf32, #tpu.memory_space<vmem>>, %arg5: memref<1x256xf32, #tpu.memory_space<vmem>>, %arg6: memref<256x256xf32, #tpu.memory_space<vmem>>, %arg7: memref<1x256xf32, #tpu.memory_space<vmem>>, %arg8: memref<1x256xf32, #tpu.memory_space<vmem>>, %arg9: memref<1x256xf32, #tpu.memory_space<vmem>>, %arg10: memref<256x128xf32, #tpu.memory_space<vmem>>, %arg11: memref<1x128xf32, #tpu.memory_space<vmem>>, %arg12: memref<8x128xf32, #tpu.memory_space<vmem>>) attributes {dimension_semantics = [#tpu.dimension_semantics<parallel>], iteration_bounds = array<i64: 1>, scalar_prefetch = 0 : i64, scratch_operands = 0 : i64, tpu.core_type = #tpu.core_type<tc>, window_params = [{transform_indices = @transform_0, window_bounds = array<i64: 8, 16>}, {pipeline_mode = #tpu.pipeline_mode<synchronous>, transform_indices = @transform_1, window_bounds = array<i64: 16, 256>}, {pipeline_mode = #tpu.pipeline_mode<synchronous>, transform_indices = @transform_2, window_bounds = array<i64: 1, 256>}, {pipeline_mode = #tpu.pipeline_mode<synchronous>, transform_indices = @transform_3, window_bounds = array<i64: 1, 256>}, {pipeline_mode = #tpu.pipeline_mode<synchronous>, transform_indices = @transform_4, window_bounds = array<i64: 1, 256>}, {pipeline_mode = #tpu.pipeline_mode<synchronous>, transform_indices = @transform_5, window_bounds = array<i64: 256, 256>}, {pipeline_mode = #tpu.pipeline_mode<synchronous>, transform_indices = @transform_6, window_bounds = array<i64: 1, 256>}, {pipeline_mode = #tpu.pipeline_mode<synchronous>, transform_indices = @transform_7, window_bounds = array<i64: 1, 256>}, {pipeline_mode = #tpu.pipeline_mode<synchronous>, transform_indices = @transform_8, window_bounds = array<i64: 1, 256>}, {pipeline_mode = #tpu.pipeline_mode<synchronous>, transform_indices = @transform_9, window_bounds = array<i64: 256, 128>}, {pipeline_mode = #tpu.pipeline_mode<synchronous>, transform_indices = @transform_10, window_bounds = array<i64: 1, 128>}, {transform_indices = @transform_11, window_bounds = array<i64: 8, 128>}]} {
    %c0 = arith.constant 0 : index
    %c0_0 = arith.constant 0 : index
    %0 = vector.load %arg1[%c0, %c0_0] : memref<8x16xf32, #tpu.memory_space<vmem>>, vector<8x16xf32>
    %c0_1 = arith.constant 0 : index
    %c0_2 = arith.constant 0 : index
    %1 = vector.load %arg2[%c0_1, %c0_2] : memref<16x256xf32, #tpu.memory_space<vmem>>, vector<16x256xf32>
    %cst = arith.constant dense<0.000000e+00> : vector<8x256xf32>
    %2 = tpu.matmul %0, %1, %cst {dimension_numbers = #tpu.dot_dimension_numbers<[1], [0], [0], [1], [0, 0, 1, 1], [], []>} : vector<8x16xf32>, vector<16x256xf32>, vector<8x256xf32> -> vector<8x256xf32>
    %c0_3 = arith.constant 0 : index
    %c0_4 = arith.constant 0 : index
    %3 = vector.load %arg3[%c0_3, %c0_4] : memref<1x256xf32, #tpu.memory_space<vmem>>, vector<1x256xf32>
    %4 = vector.broadcast %3 : vector<1x256xf32> to vector<8x256xf32>
    %5 = arith.addf %2, %4 : vector<8x256xf32>
    %cst_5 = arith.constant 0.000000e+00 : f32
    %6 = vector.broadcast %cst_5 : f32 to vector<8x256xf32>
    %7 = arith.maximumf %5, %6 : vector<8x256xf32>
    %c0_6 = arith.constant 0 : index
    %c0_7 = arith.constant 0 : index
    %8 = vector.load %arg4[%c0_6, %c0_7] : memref<1x256xf32, #tpu.memory_space<vmem>>, vector<1x256xf32>
    %c0_8 = arith.constant 0 : index
    %c0_9 = arith.constant 0 : index
    %9 = vector.load %arg5[%c0_8, %c0_9] : memref<1x256xf32, #tpu.memory_space<vmem>>, vector<1x256xf32>
    %cst_10 = arith.constant dense<0.000000e+00> : vector<8xf32>
    %10 = vector.multi_reduction <add>, %7, %cst_10 [1] : vector<8x256xf32> to vector<8xf32>
    %11 = vector.shape_cast %10 : vector<8xf32> to vector<8x1xf32>
    %cst_11 = arith.constant 2.560000e+02 : f32
    %12 = vector.broadcast %cst_11 : f32 to vector<8x1xf32>
    %13 = arith.divf %11, %12 : vector<8x1xf32>
    %14 = arith.mulf %7, %7 : vector<8x256xf32>
    %cst_12 = arith.constant dense<0.000000e+00> : vector<8xf32>
    %15 = vector.multi_reduction <add>, %14, %cst_12 [1] : vector<8x256xf32> to vector<8xf32>
    %16 = vector.shape_cast %15 : vector<8xf32> to vector<8x1xf32>
    %cst_13 = arith.constant 2.560000e+02 : f32
    %17 = vector.broadcast %cst_13 : f32 to vector<8x1xf32>
    %18 = arith.divf %16, %17 : vector<8x1xf32>
    %19 = arith.mulf %13, %13 : vector<8x1xf32>
    %20 = arith.subf %18, %19 : vector<8x1xf32>
    %21 = vector.broadcast %13 : vector<8x1xf32> to vector<8x256xf32>
    %22 = arith.subf %7, %21 : vector<8x256xf32>
    %cst_14 = arith.constant 9.99999974E-6 : f32
    %23 = vector.broadcast %cst_14 : f32 to vector<8x1xf32>
    %24 = arith.addf %20, %23 : vector<8x1xf32>
    %25 = math.rsqrt %24 : vector<8x1xf32>
    %26 = vector.broadcast %25 : vector<8x1xf32> to vector<8x256xf32>
    %27 = arith.mulf %22, %26 : vector<8x256xf32>
    %28 = vector.broadcast %8 : vector<1x256xf32> to vector<8x256xf32>
    %29 = arith.mulf %27, %28 : vector<8x256xf32>
    %30 = vector.broadcast %9 : vector<1x256xf32> to vector<8x256xf32>
    %31 = arith.addf %29, %30 : vector<8x256xf32>
    %c0_15 = arith.constant 0 : index
    %c0_16 = arith.constant 0 : index
    %32 = vector.load %arg6[%c0_15, %c0_16] : memref<256x256xf32, #tpu.memory_space<vmem>>, vector<256x256xf32>
    %cst_17 = arith.constant dense<0.000000e+00> : vector<8x256xf32>
    %33 = tpu.matmul %31, %32, %cst_17 {dimension_numbers = #tpu.dot_dimension_numbers<[1], [0], [0], [1], [0, 0, 1, 1], [], []>} : vector<8x256xf32>, vector<256x256xf32>, vector<8x256xf32> -> vector<8x256xf32>
    %c0_18 = arith.constant 0 : index
    %c0_19 = arith.constant 0 : index
    %34 = vector.load %arg7[%c0_18, %c0_19] : memref<1x256xf32, #tpu.memory_space<vmem>>, vector<1x256xf32>
    %35 = vector.broadcast %34 : vector<1x256xf32> to vector<8x256xf32>
    %36 = arith.addf %33, %35 : vector<8x256xf32>
    %cst_20 = arith.constant 0.000000e+00 : f32
    %37 = vector.broadcast %cst_20 : f32 to vector<8x256xf32>
    %38 = arith.maximumf %36, %37 : vector<8x256xf32>
    %c0_21 = arith.constant 0 : index
    %c0_22 = arith.constant 0 : index
    %39 = vector.load %arg8[%c0_21, %c0_22] : memref<1x256xf32, #tpu.memory_space<vmem>>, vector<1x256xf32>
    %c0_23 = arith.constant 0 : index
    %c0_24 = arith.constant 0 : index
    %40 = vector.load %arg9[%c0_23, %c0_24] : memref<1x256xf32, #tpu.memory_space<vmem>>, vector<1x256xf32>
    %cst_25 = arith.constant dense<0.000000e+00> : vector<8xf32>
    %41 = vector.multi_reduction <add>, %38, %cst_25 [1] : vector<8x256xf32> to vector<8xf32>
    %42 = vector.shape_cast %41 : vector<8xf32> to vector<8x1xf32>
    %cst_26 = arith.constant 2.560000e+02 : f32
    %43 = vector.broadcast %cst_26 : f32 to vector<8x1xf32>
    %44 = arith.divf %42, %43 : vector<8x1xf32>
    %45 = arith.mulf %38, %38 : vector<8x256xf32>
    %cst_27 = arith.constant dense<0.000000e+00> : vector<8xf32>
    %46 = vector.multi_reduction <add>, %45, %cst_27 [1] : vector<8x256xf32> to vector<8xf32>
    %47 = vector.shape_cast %46 : vector<8xf32> to vector<8x1xf32>
    %cst_28 = arith.constant 2.560000e+02 : f32
    %48 = vector.broadcast %cst_28 : f32 to vector<8x1xf32>
    %49 = arith.divf %47, %48 : vector<8x1xf32>
    %50 = arith.mulf %44, %44 : vector<8x1xf32>
    %51 = arith.subf %49, %50 : vector<8x1xf32>
    %52 = vector.broadcast %44 : vector<8x1xf32> to vector<8x256xf32>
    %53 = arith.subf %38, %52 : vector<8x256xf32>
    %cst_29 = arith.constant 9.99999974E-6 : f32
    %54 = vector.broadcast %cst_29 : f32 to vector<8x1xf32>
    %55 = arith.addf %51, %54 : vector<8x1xf32>
    %56 = math.rsqrt %55 : vector<8x1xf32>
    %57 = vector.broadcast %56 : vector<8x1xf32> to vector<8x256xf32>
    %58 = arith.mulf %53, %57 : vector<8x256xf32>
    %59 = vector.broadcast %39 : vector<1x256xf32> to vector<8x256xf32>
    %60 = arith.mulf %58, %59 : vector<8x256xf32>
    %61 = vector.broadcast %40 : vector<1x256xf32> to vector<8x256xf32>
    %62 = arith.addf %60, %61 : vector<8x256xf32>
    %c0_30 = arith.constant 0 : index
    %c0_31 = arith.constant 0 : index
    %63 = vector.load %arg10[%c0_30, %c0_31] : memref<256x128xf32, #tpu.memory_space<vmem>>, vector<256x128xf32>
    %cst_32 = arith.constant dense<0.000000e+00> : vector<8x128xf32>
    %64 = tpu.matmul %62, %63, %cst_32 {dimension_numbers = #tpu.dot_dimension_numbers<[1], [0], [0], [1], [0, 0, 1, 1], [], []>} : vector<8x256xf32>, vector<256x128xf32>, vector<8x128xf32> -> vector<8x128xf32>
    %c0_33 = arith.constant 0 : index
    %c0_34 = arith.constant 0 : index
    %65 = vector.load %arg11[%c0_33, %c0_34] : memref<1x128xf32, #tpu.memory_space<vmem>>, vector<1x128xf32>
    %66 = vector.broadcast %65 : vector<1x128xf32> to vector<8x128xf32>
    %67 = arith.addf %64, %66 : vector<8x128xf32>
    %c0_35 = arith.constant 0 : index
    %c0_36 = arith.constant 0 : index
    %68 = vector.load %arg12[%c0_35, %c0_36] : memref<8x128xf32, #tpu.memory_space<vmem>>, vector<8x128xf32>
    tpu.vector_store %arg12[%c0_35, %c0_36], %67 {strides = array<i32>} : memref<8x128xf32, #tpu.memory_space<vmem>>, vector<8x128xf32>,
    return
  }
  func.func @transform_0(%arg0: i32) -> (i32, i32) {
    %c0_i32 = arith.constant 0 : i32
    %c0_i32_0 = arith.constant 0 : i32
    return %arg0, %c0_i32 : i32, i32
  }
  func.func @transform_1(%arg0: i32) -> (i32, i32) {
    %c0_i32 = arith.constant 0 : i32
    %c0_i32_0 = arith.constant 0 : i32
    %c0_i32_1 = arith.constant 0 : i32
    return %c0_i32, %c0_i32_0 : i32, i32
  }
  func.func @transform_2(%arg0: i32) -> (i32, i32) {
    %c0_i32 = arith.constant 0 : i32
    %c0_i32_0 = arith.constant 0 : i32
    %c0_i32_1 = arith.constant 0 : i32
    return %c0_i32, %c0_i32_0 : i32, i32
  }
  func.func @transform_3(%arg0: i32) -> (i32, i32) {
    %c0_i32 = arith.constant 0 : i32
    %c0_i32_0 = arith.constant 0 : i32
    %c0_i32_1 = arith.constant 0 : i32
    return %c0_i32, %c0_i32_0 : i32, i32
  }
  func.func @transform_4(%arg0: i32) -> (i32, i32) {
    %c0_i32 = arith.constant 0 : i32
    %c0_i32_0 = arith.constant 0 : i32
    %c0_i32_1 = arith.constant 0 : i32
    return %c0_i32, %c0_i32_0 : i32, i32
  }
  func.func @transform_5(%arg0: i32) -> (i32, i32) {
    %c0_i32 = arith.constant 0 : i32
    %c0_i32_0 = arith.constant 0 : i32
    %c0_i32_1 = arith.constant 0 : i32
    return %c0_i32, %c0_i32_0 : i32, i32
  }
  func.func @transform_6(%arg0: i32) -> (i32, i32) {
    %c0_i32 = arith.constant 0 : i32
    %c0_i32_0 = arith.constant 0 : i32
    %c0_i32_1 = arith.constant 0 : i32
    return %c0_i32, %c0_i32_0 : i32, i32
  }
  func.func @transform_7(%arg0: i32) -> (i32, i32) {
    %c0_i32 = arith.constant 0 : i32
    %c0_i32_0 = arith.constant 0 : i32
    %c0_i32_1 = arith.constant 0 : i32
    return %c0_i32, %c0_i32_0 : i32, i32
  }
  func.func @transform_8(%arg0: i32) -> (i32, i32) {
    %c0_i32 = arith.constant 0 : i32
    %c0_i32_0 = arith.constant 0 : i32
    %c0_i32_1 = arith.constant 0 : i32
    return %c0_i32, %c0_i32_0 : i32, i32
  }
  func.func @transform_9(%arg0: i32) -> (i32, i32) {
    %c0_i32 = arith.constant 0 : i32
    %c0_i32_0 = arith.constant 0 : i32
    %c0_i32_1 = arith.constant 0 : i32
    return %c0_i32, %c0_i32_0 : i32, i32
  }
  func.func @transform_10(%arg0: i32) -> (i32, i32) {
    %c0_i32 = arith.constant 0 : i32
    %c0_i32_0 = arith.constant 0 : i32
    %c0_i32_1 = arith.constant 0 : i32
    return %c0_i32, %c0_i32_0 : i32, i32
  }
  func.func @transform_11(%arg0: i32) -> (i32, i32) {
    %c0_i32 = arith.constant 0 : i32
    %c0_i32_0 = arith.constant 0 : i32
    return %arg0, %c0_i32 : i32, i32
  }
}

</mosaic_0001>

<bundles_post_ra>
// kernel: tpu_custom_call.1
= control target key start
LH: loop header
LB: loop body
LE: loop exit
PB: predicated region body
PF: predicated region fallthrough
CT: control target
= control target key end

     0   :  { %16 = vsyncpa [#allocation3], 0  ;;  %s915_s0 = inlined_call_operand.hbm [shape: f32[8,16], index: 0, kind: input, shape index: {}]   ;;  %s916_s1 = inlined_call_operand.hbm [shape: f32[16,256], index: 1, kind: input, shape index: {}]   ;;  %s917_s2 = inlined_call_operand.hbm [shape: f32[1,256], index: 2, kind: input, shape index: {}]   ;;  %s918_s3 = inlined_call_operand.vmem [shape: f32[1,256], index: 3, kind: input, shape index: {}]   ;;  %s919_s4 = inlined_call_operand.hbm [shape: f32[1,256], index: 4, kind: input, shape index: {}]   ;;  %s920_s5 = inlined_call_operand.hbm [shape: f32[256,256], index: 5, kind: input, shape index: {}]   ;;  %s921_s6 = inlined_call_operand.vmem [shape: f32[1,256], index: 6, kind: input, shape index: {}]   ;;  %s922_s7 = inlined_call_operand.vmem [shape: f32[1,256], index: 7, kind: input, shape index: {}]   ;;  %s923_s8 = inlined_call_operand.hbm [shape: f32[1,256], index: 8, kind: input, shape index: {}]   ;;  %s924_s9 = inlined_call_operand.hbm [shape: f32[256,128], index: 9, kind: input, shape index: {}]   ;;  %s925_s10 = inlined_call_operand.vmem [shape: f32[1,128], index: 10, kind: input, shape index: {}]   ;;  %s926_s11 = inlined_call_operand.hbm [shape: f32[8,128], index: 11, kind: output, shape index: {}]  }
   0x1   :  { %17 = vsyncpa [#allocation6], 0 }
   0x2   :  { %18 = vsyncpa [#allocation9], 0 }
   0x3   :  { %19 = vsyncpa [#allocation12], 0  ;;  %s36_s19 = sshll.u32 %s916_s1, 4  ;;  %s37_s19 = int_to_ptr.hbm [resolvable:$true] %s36_s19 }
   0x4   :  { %20 = vsyncpa [#allocation4], 0  ;;  %s763_s20 = smov [#allocation5]   ;;  %s63_s24 = sshll.u32 %s919_s4, 4  ;;  %s64_s24 = int_to_ptr.hbm [resolvable:$true] %s63_s24 }
   0x5   :  { %s38_s21 = sshll.u32 %s763_s20, 4  ;;  %s764_s25 = smov 256   ;;  %s39_s21 = int_to_ptr.vmem [resolvable:$true] %s38_s21 }
   0x6   :  { %s765_s26 = smov 16   ;;  %s766_s27 = smov [#allocation8]  }
   0x7   :  { %44 = dma.hbm_to_vmem [thread:$0]  %s37_s19, 512, %s39_s21, [#allocation6], %s764_s25, %s764_s25, %s765_s26  }
   0x8   :  { %s65_s28 = sshll.u32 %s766_s27, 4  ;;  %s91_s30 = sshll.u32 %s923_s8, 4  ;;  %s66_s28 = int_to_ptr.vmem [resolvable:$true] %s65_s28  ;;  %s92_s30 = int_to_ptr.hbm [resolvable:$true] %s91_s30 }
   0x9   :  { %68 = dma.hbm_to_vmem [thread:$0]  %s64_s24, 32, %s66_s28, [#allocation9]  }
   0xa   :  { %s26_s4 = sshll.u32 %s915_s0, 4  ;;  %s767_s14 = smov [#allocation11]   ;;  %s27_s4 = int_to_ptr.hbm [resolvable:$true] %s26_s4 }
   0xb   :  { %s93_s15 = sshll.u32 %s767_s14, 4  ;;  %s768_s16 = smov [#allocation2]   ;;  %s94_s15 = int_to_ptr.vmem [resolvable:$true] %s93_s15 }
   0xc   :  { %96 = dma.hbm_to_vmem [thread:$0]  %s92_s30, 32, %s94_s15, [#allocation12]  }
   0xd   :  { %s28_s17 = sshll.u32 %s768_s16, 4  ;;  %s50_s20 = sshll.u32 %s917_s2, 4  ;;  %s29_s17 = int_to_ptr.vmem [resolvable:$true] %s28_s17  ;;  %s51_s20 = int_to_ptr.hbm [resolvable:$true] %s50_s20 }
   0xe   :  { %31 = dma.hbm_to_vmem [thread:$0]  %s27_s4, 128, %s29_s17, [#allocation3]  }
   0xf   :  { %s73_s22 = sshll.u32 %s920_s5, 4  ;;  %s769_s23 = smov [#allocation7]   ;;  %s74_s22 = int_to_ptr.hbm [resolvable:$true] %s73_s22 }
  0x10   :  { %s52_s0 = sshll.u32 %s769_s23, 4  ;;  %s770_s24 = smov [#allocation10]   ;;  %s53_s0 = int_to_ptr.vmem [resolvable:$true] %s52_s0 }
  0x11   :  { %55 = dma.hbm_to_vmem [thread:$0]  %s51_s20, 32, %s53_s0, [#allocation6]  }
  0x12   :  { %s75_s27 = sshll.u32 %s770_s24, 4  ;;  %s101_s1 = sshll.u32 %s924_s9, 4  ;;  %s76_s27 = int_to_ptr.vmem [resolvable:$true] %s75_s27  ;;  %s102_s1 = int_to_ptr.hbm [resolvable:$true] %s101_s1 }
  0x13   :  { %81 = dma.hbm_to_vmem [thread:$0]  %s74_s22, 8192, %s76_s27, [#allocation9], %s764_s25, %s764_s25, %s765_s26  }
  0x14   :  { %s771_s2 = smov [#allocation13]   ;;  %s772_s5 = smov 128  }
  0x15   :  { %s103_s30 = sshll.u32 %s771_s2, 4  ;;  %s773_s12 = smov 8   ;;  %s104_s30 = int_to_ptr.vmem [resolvable:$true] %s103_s30 }
  0x16   :  { %109 = dma.hbm_to_vmem [thread:$0]  %s102_s1, 4096, %s104_s30, [#allocation12], %s772_s5, %s772_s5, %s773_s12  }
  0x17   :  { %753 = dma.done.wait [#allocation3], 128  }
  0x18   :  { %754 = vsyncadd [#allocation3], 4294967168 }
  0x19   :  { %755 = dma.done.wait [#allocation6], 544  }
  0x1a   :  { %756 = vsyncadd [#allocation6], 4294966752 }
  0x1b   :  { %757 = dma.done.wait [#allocation9], 8224  }
  0x1c   :  { %758 = vsyncadd [#allocation9], 4294959072 }
  0x1d   :  { %759 = dma.done.wait [#allocation12], 4128  }
  0x1e   :  { %760 = vsyncadd [#allocation12], 4294963168  ;;  %v143_v0 = vld [vmem:[#allocation5 + $0x10] sm:$0xff]  ;;  %v144_v1 = vld [vmem:[#allocation5 + $0x18] sm:$0xff]  ;;  %vm151_vm0 = vcmask 130048   ;;  %v774_v22 = vmov 256.0  }
  0x1f   :  { %v141_v2 = vld [vmem:[#allocation5] sm:$0xff]  ;;  %169 = vmatpush.msra.mxu0 %v143_v0  ;;  %189 = vmatpush.msra.mxu1 %v144_v1  ;;  %v142_v3 = vld [vmem:[#allocation5 + $0x8] sm:$0xff]  ;;  %v140_v4 = vld [vmem:[#allocation2] sm:$0xff]  ;;  %555 = vrcp.f32 %v774_v22  ;;  %s775_s14 = smov [#allocation14]   ;;  %s526_s18 = sshll.u32 %s926_s11, 4  ;;  %s527_s18 = int_to_ptr.hbm [resolvable:$true] %s526_s18 }
  0x20   :  { %v145_v5 = vld [vmem:[#allocation7] sm:$0x3]  ;;  %v277_v18 = vld [vmem:[#allocation10 + $0xf0] sm:$0xff]  ;;  %v275_v23 = vld [vmem:[#allocation10 + $0xe0] sm:$0xff]  ;;  %s524_s15 = sshll.u32 %s775_s14, 4  ;;  %s525_s15 = int_to_ptr.vmem [resolvable:$true] %s524_s15 }
  0x21   :  { %170 = vmatpush.msra.mxu0 %v141_v2  ;;  %190 = vmatpush.msra.mxu1 %v142_v3  ;;  %v147_v6 = vperm.slane %v145_v5, 0  ;;  %v148_v7 = vperm.slane %v145_v5, 1  ;;  %v309_v19 = vld [vmem:[#allocation10 + $0x1f0] sm:$0xff]  ;;  %v278_v20 = vld [vmem:[#allocation10 + $0xf8] sm:$0xff]  ;;  %v307_v24 = vld [vmem:[#allocation10 + $0x1e0] sm:$0xff] }
  0x22   :  { %539 = vmatmul.msk.f32.vlgmr.msra.gmra.mxu0 %vm151_vm0, %v140_v4  ;;  %540 = vmatmul.msk.f32.vlgmr.msra.gmra.mxu1 %vm151_vm0, %v140_v4  ;;  %v310_v21 = vld [vmem:[#allocation10 + $0x1f8] sm:$0xff]  ;;  %v276_v25 = vld [vmem:[#allocation10 + $0xe8] sm:$0xff]  ;;  %v273_v27 = vld [vmem:[#allocation10 + $0xd0] sm:$0xff] }
  0x23   :  { %317 = vmatpush.msra.mxu2 %v277_v18  ;;  %337 = vmatpush.msra.mxu3 %v309_v19  ;;  %v308_v26 = vld [vmem:[#allocation10 + $0x1e8] sm:$0xff]  ;;  %v305_v28 = vld [vmem:[#allocation10 + $0x1d0] sm:$0xff]  ;;  %v274_v29 = vld [vmem:[#allocation10 + $0xd8] sm:$0xff] }
  0x24   :  { %357 = vmatpush.msrb.mxu0 %v278_v20  ;;  %377 = vmatpush.msrb.mxu1 %v310_v21  ;;  %v306_v30 = vld [vmem:[#allocation10 + $0x1d8] sm:$0xff]  ;;  %v271_v31 = vld [vmem:[#allocation10 + $0xc0] sm:$0xff]  ;;  %v272_v33 = vld [vmem:[#allocation10 + $0xc8] sm:$0xff] }
  0x25   :  { %318 = vmatpush.msra.mxu2 %v275_v23  ;;  %338 = vmatpush.msra.mxu3 %v307_v24  ;;  %v303_v32 = vld [vmem:[#allocation10 + $0x1c0] sm:$0xff]  ;;  %v304_v34 = vld [vmem:[#allocation10 + $0x1c8] sm:$0xff]  ;;  %v873_v35 = vpop.eup %555  ;;  %v269_v36 = vld [vmem:[#allocation10 + $0xb0] sm:$0xff] }
  0x26   :  { %358 = vmatpush.msrb.mxu0 %v276_v25  ;;  %378 = vmatpush.msrb.mxu1 %v308_v26  ;;  %v301_v37 = vld [vmem:[#allocation10 + $0x1b0] sm:$0xff]  ;;  %v270_v38 = vld [vmem:[#allocation10 + $0xb8] sm:$0xff]  ;;  %v267_v40 = vld [vmem:[#allocation10 + $0xa0] sm:$0xff]  ;;  %v203_v43 = vmul.f32 256.0, %v873_v35  ;;  %vm207_vm1 = vweird.f32 %v873_v35 }
  0x27   :  { %319 = vmatpush.msra.mxu2 %v273_v27  ;;  %339 = vmatpush.msra.mxu3 %v305_v28  ;;  %v302_v39 = vld [vmem:[#allocation10 + $0x1b8] sm:$0xff]  ;;  %v299_v41 = vld [vmem:[#allocation10 + $0x1a0] sm:$0xff]  ;;  %v268_v42 = vld [vmem:[#allocation10 + $0xa8] sm:$0xff] }
  0x28   :  { %359 = vmatpush.msrb.mxu0 %v274_v29  ;;  %379 = vmatpush.msrb.mxu1 %v306_v30  ;;  %v300_v44 = vld [vmem:[#allocation10 + $0x1a8] sm:$0xff]  ;;  %v265_v45 = vld [vmem:[#allocation10 + $0x90] sm:$0xff]  ;;  %v266_v47 = vld [vmem:[#allocation10 + $0x98] sm:$0xff]  ;;  %v204_v52 = vsub.f32 1.0, %v203_v43 }
  0x29   :  { %320 = vmatpush.msra.mxu2 %v271_v31  ;;  %340 = vmatpush.msra.mxu3 %v303_v32  ;;  %v297_v46 = vld [vmem:[#allocation10 + $0x190] sm:$0xff]  ;;  %v298_v48 = vld [vmem:[#allocation10 + $0x198] sm:$0xff]  ;;  %v263_v49 = vld [vmem:[#allocation10 + $0x80] sm:$0xff] }
  0x2a   :  { %360 = vmatpush.msrb.mxu0 %v272_v33  ;;  %380 = vmatpush.msrb.mxu1 %v304_v34  ;;  %v295_v50 = vld [vmem:[#allocation10 + $0x180] sm:$0xff]  ;;  %v264_v51 = vld [vmem:[#allocation10 + $0x88] sm:$0xff]  ;;  %v261_v54 = vld [vmem:[#allocation10 + $0x70] sm:$0xff]  ;;  %v205_v61 = vmul.f32 %v873_v35, %v204_v52 }
  0x2b   :  { %321 = vmatpush.msra.mxu2 %v269_v36  ;;  %341 = vmatpush.msra.mxu3 %v301_v37  ;;  %v296_v53 = vld [vmem:[#allocation10 + $0x188] sm:$0xff]  ;;  %v293_v55 = vld [vmem:[#allocation10 + $0x170] sm:$0xff]  ;;  %v262_v56 = vld [vmem:[#allocation10 + $0x78] sm:$0xff] }
  0x2c   :  { %361 = vmatpush.msrb.mxu0 %v270_v38  ;;  %381 = vmatpush.msrb.mxu1 %v302_v39  ;;  %v294_v57 = vld [vmem:[#allocation10 + $0x178] sm:$0xff]  ;;  %v259_v58 = vld [vmem:[#allocation10 + $0x60] sm:$0xff]  ;;  %v260_v60 = vld [vmem:[#allocation10 + $0x68] sm:$0xff] }
  0x2d   :  { %322 = vmatpush.msra.mxu2 %v267_v40  ;;  %342 = vmatpush.msra.mxu3 %v299_v41  ;;  %v291_v59 = vld [vmem:[#allocation10 + $0x160] sm:$0xff]  ;;  %v292_v62 = vld [vmem:[#allocation10 + $0x168] sm:$0xff]  ;;  %v257_v63 = vld [vmem:[#allocation10 + $0x50] sm:$0xff] }
  0x2e   :  { %362 = vmatpush.msrb.mxu0 %v268_v42  ;;  %382 = vmatpush.msrb.mxu1 %v300_v44  ;;  %v289_v0 = vld [vmem:[#allocation10 + $0x150] sm:$0xff]  ;;  %v258_v1 = vld [vmem:[#allocation10 + $0x58] sm:$0xff]  ;;  %v255_v3 = vld [vmem:[#allocation10 + $0x40] sm:$0xff] }
  0x2f   :  { %323 = vmatpush.msra.mxu2 %v265_v45  ;;  %343 = vmatpush.msra.mxu3 %v297_v46  ;;  %v290_v2 = vld [vmem:[#allocation10 + $0x158] sm:$0xff]  ;;  %v287_v4 = vld [vmem:[#allocation10 + $0x140] sm:$0xff]  ;;  %v256_v5 = vld [vmem:[#allocation10 + $0x48] sm:$0xff] }
  0x30   :  { %363 = vmatpush.msrb.mxu0 %v266_v47  ;;  %383 = vmatpush.msrb.mxu1 %v298_v48  ;;  %v284_v18 = vld [vmem:[#allocation10 + $0x128] sm:$0xff]  ;;  %v249_v19 = vld [vmem:[#allocation10 + $0x10] sm:$0xff]  ;;  %v250_v22 = vld [vmem:[#allocation10 + $0x18] sm:$0xff] }
  0x31   :  { %324 = vmatpush.msra.mxu2 %v263_v49  ;;  %344 = vmatpush.msra.mxu3 %v295_v50  ;;  %v281_v20 = vld [vmem:[#allocation10 + $0x110] sm:$0xff]  ;;  %v282_v23 = vld [vmem:[#allocation10 + $0x118] sm:$0xff]  ;;  %v247_v24 = vld [vmem:[#allocation10] sm:$0xff] }
  0x32   :  { %364 = vmatpush.msrb.mxu0 %v264_v51  ;;  %384 = vmatpush.msrb.mxu1 %v296_v53  ;;  %v279_v25 = vld [vmem:[#allocation10 + $0x100] sm:$0xff]  ;;  %v248_v26 = vld [vmem:[#allocation10 + $0x8] sm:$0xff]  ;;  %v197_v39 = vld [vmem:[%s918_s3] sm:$0x3] }
  0x33   :  { %325 = vmatpush.msra.mxu2 %v261_v54  ;;  %345 = vmatpush.msra.mxu3 %v293_v55  ;;  %v280_v27 = vld [vmem:[#allocation10 + $0x108] sm:$0xff]  ;;  %v198_v40 = vld [vmem:[#allocation8] sm:$0x3]  ;;  %v234_v44 = vperm.slane %v197_v39, 0  ;;  %v235_v45 = vperm.slane %v197_v39, 1 }
  0x34   :  { %365 = vmatpush.msrb.mxu0 %v262_v56  ;;  %385 = vmatpush.msrb.mxu1 %v294_v57  ;;  %v241_v48 = vperm.slane %v198_v40, 0  ;;  %v242_v50 = vperm.slane %v198_v40, 1  ;;  %v459_v39 = vld [vmem:[#allocation13 + $0x88] sm:$0xff]  ;;  %v442_v40 = vld [vmem:[#allocation13] sm:$0xff] }
  0x35   :  { %326 = vmatpush.msra.mxu2 %v259_v58  ;;  %346 = vmatpush.msra.mxu3 %v291_v59 }
  0x36   :  { %366 = vmatpush.msrb.mxu0 %v260_v60  ;;  %386 = vmatpush.msrb.mxu1 %v292_v62 }
  0x37   :  { %327 = vmatpush.msra.mxu2 %v257_v63  ;;  %347 = vmatpush.msra.mxu3 %v289_v0 }
  0x38   :  { %367 = vmatpush.msrb.mxu0 %v258_v1  ;;  %387 = vmatpush.msrb.mxu1 %v290_v2 }
  0x39   :  { %328 = vmatpush.msra.mxu2 %v255_v3  ;;  %348 = vmatpush.msra.mxu3 %v287_v4 }
  0x3a   :  { %368 = vmatpush.msrb.mxu0 %v256_v5 }
  0x9f   :  { %v172_v8 = vpop.f32.mrf.mxu0  ;;  %v192_v9 = vpop.f32.mrf.mxu1 }
  0xa0   :  { %v173_v10 = vadd.f32 %v172_v8, %v147_v6  ;;  %v193_v11 = vadd.f32 %v192_v9, %v148_v7  ;;  %v288_v6 = vld [vmem:[#allocation10 + $0x148] sm:$0xff]  ;;  %v253_v7 = vld [vmem:[#allocation10 + $0x30] sm:$0xff]  ;;  %v206_v8 = vadd.f32 %v873_v35, %v205_v61 }
  0xa1   :  { %v285_v9 = vld [vmem:[#allocation10 + $0x130] sm:$0xff]  ;;  %388 = vmatpush.msrb.mxu1 %v288_v6  ;;  %329 = vmatpush.msra.mxu2 %v253_v7  ;;  %v457_v6 = vld [vmem:[#allocation13 + $0x78] sm:$0xff] }
  0xa2   :  { %v863_v12 = vmax.f32 %v173_v10, 0.0  ;;  %v865_v13 = vmax.f32 %v193_v11, 0.0  ;;  %v254_v10 = vld [vmem:[#allocation10 + $0x38] sm:$0xff]  ;;  %349 = vmatpush.msra.mxu3 %v285_v9  ;;  %v880_v21 = vsel %vm207_vm1, %v873_v35, %v206_v8 }
  0xa3   :  { %v286_v11 = vld [vmem:[#allocation10 + $0x138] sm:$0xff]  ;;  %369 = vmatpush.msrb.mxu0 %v254_v10  ;;  %v455_v10 = vld [vmem:[#allocation13 + $0x68] sm:$0xff] }
  0xa4   :  { %v199_v14 = vadd.f32 %v865_v13, %v863_v12  ;;  %v210_v15 = vmul.f32 %v863_v12, %v863_v12  ;;  %v211_v16 = vmul.f32 %v865_v13, %v865_v13  ;;  %389 = vmatpush.msrb.mxu1 %v286_v11  ;;  %v473_v7 = vld [vmem:[#allocation13 + $0xf8] sm:$0xff]  ;;  %v456_v8 = vld [vmem:[#allocation13 + $0x70] sm:$0xff]  ;;  %v471_v11 = vld [vmem:[#allocation13 + $0xe8] sm:$0xff] }
  0xa5   :  { %v472_v9 = vld [vmem:[#allocation13 + $0xf0] sm:$0xff] }
  0xa6   :  { %200 = vadd.xlane.f32.xlu0 %v199_v14  ;;  %v212_v17 = vadd.f32 %v211_v16, %v210_v15  ;;  %v251_v14 = vld [vmem:[#allocation10 + $0x20] sm:$0xff]  ;;  %390 = vmatpush.msrb.mxu1 %v284_v18  ;;  %v452_v18 = vld [vmem:[#allocation13 + $0x50] sm:$0xff] }
  0xa7   :  { %v283_v15 = vld [vmem:[#allocation10 + $0x120] sm:$0xff]  ;;  %330 = vmatpush.msra.mxu2 %v251_v14 }
  0xa8   :  { %350 = vmatpush.msra.mxu3 %v283_v15  ;;  %391 = vmatpush.msrb.mxu1 %v282_v23  ;;  %v454_v14 = vld [vmem:[#allocation13 + $0x60] sm:$0xff] }
  0xa9   :  { %331 = vmatpush.msra.mxu2 %v249_v19  ;;  %v470_v15 = vld [vmem:[#allocation13 + $0xe0] sm:$0xff]  ;;  %v468_v19 = vld [vmem:[#allocation13 + $0xd0] sm:$0xff] }
  0xaa   :  { %351 = vmatpush.msra.mxu3 %v281_v20  ;;  %392 = vmatpush.msrb.mxu1 %v280_v27  ;;  %v451_v20 = vld [vmem:[#allocation13 + $0x48] sm:$0xff]  ;;  %v450_v23 = vld [vmem:[#allocation13 + $0x40] sm:$0xff]  ;;  %v448_v27 = vld [vmem:[#allocation13 + $0x30] sm:$0xff] }
  0xab   :  { %332 = vmatpush.msra.mxu2 %v247_v24  ;;  %v466_v24 = vld [vmem:[#allocation13 + $0xc0] sm:$0xff] }
  0xac   :  { %352 = vmatpush.msra.mxu3 %v279_v25  ;;  %v449_v25 = vld [vmem:[#allocation13 + $0x38] sm:$0xff] }
  0xad   :  { %478 = vmatpush.msrb.mxu2 %v457_v6 }
  0xae   :  { %213 = vadd.xlane.f32.xlu0 %v212_v17  ;;  %v252_v17 = vld [vmem:[#allocation10 + $0x28] sm:$0xff]  ;;  %498 = vmatpush.msrb.mxu3 %v473_v7 }
  0xaf   :  { %370 = vmatpush.msrb.mxu0 %v252_v17  ;;  %479 = vmatpush.msrb.mxu2 %v456_v8  ;;  %v469_v17 = vld [vmem:[#allocation13 + $0xd8] sm:$0xff] }
  0xb0   :  { %499 = vmatpush.msrb.mxu3 %v472_v9 }
  0xb1   :  { %371 = vmatpush.msrb.mxu0 %v250_v22  ;;  %480 = vmatpush.msrb.mxu2 %v455_v10  ;;  %v467_v22 = vld [vmem:[#allocation13 + $0xc8] sm:$0xff] }
  0xb2   :  { %500 = vmatpush.msrb.mxu3 %v471_v11 }
  0xb3   :  { %372 = vmatpush.msrb.mxu0 %v248_v26  ;;  %481 = vmatpush.msrb.mxu2 %v454_v14  ;;  %v465_v26 = vld [vmem:[#allocation13 + $0xb8] sm:$0xff] }
  0xb4   :  { %501 = vmatpush.msrb.mxu3 %v470_v15 }
  0xb6   :  { %502 = vmatpush.msrb.mxu3 %v469_v17 }
  0xb8   :  { %503 = vmatpush.msrb.mxu3 %v468_v19 }
  0xba   :  { %504 = vmatpush.msrb.mxu3 %v467_v22 }
  0xbc   :  { %505 = vmatpush.msrb.mxu3 %v466_v24 }
  0xbe   :  { %506 = vmatpush.msrb.mxu3 %v465_v26 }
 0x119   :  { %v201_v16 = vpop.xlane.xlu0 %200 }
 0x11a   :  { %v209_v28 = vmul.f32 %v880_v21, %v201_v16  ;;  %v453_v16 = vld [vmem:[#allocation13 + $0x58] sm:$0xff] }
 0x11b   :  { %482 = vmatpush.msrb.mxu2 %v453_v16 }
 0x11c   :  { %v216_v30 = vmul.f32 %v209_v28, %v209_v28  ;;  %v218_v42 = vsub.f32 %v863_v12, %v209_v28  ;;  %v219_v43 = vsub.f32 %v865_v13, %v209_v28  ;;  %v311_v12 = vld [vmem:[%s921_s6] sm:$0x3] }
 0x11d   :  { %v314_v13 = vperm.slane %v311_v12, 1  ;;  %v313_v57 = vperm.slane %v311_v12, 0  ;;  %483 = vmatpush.msrb.mxu2 %v452_v18  ;;  %v464_v28 = vld [vmem:[#allocation13 + $0xb0] sm:$0xff]  ;;  %v400_v12 = vld [vmem:[#allocation11] sm:$0x3] }
 0x11e   :  { %507 = vmatpush.msrb.mxu3 %v464_v28 }
 0x11f   :  { %484 = vmatpush.msrb.mxu2 %v451_v20 }
 0x121   :  { %v214_v29 = vpop.xlane.xlu0 %213  ;;  %485 = vmatpush.msrb.mxu2 %v450_v23 }
 0x122   :  { %v215_v31 = vmul.f32 %v214_v29, %v880_v21  ;;  %v447_v29 = vld [vmem:[#allocation13 + $0x28] sm:$0xff] }
 0x123   :  { %486 = vmatpush.msrb.mxu2 %v449_v25 }
 0x124   :  { %v217_v32 = vsub.f32 %v215_v31, %v216_v30  ;;  %v463_v30 = vld [vmem:[#allocation13 + $0xa8] sm:$0xff]  ;;  %v446_v31 = vld [vmem:[#allocation13 + $0x20] sm:$0xff] }
 0x125   :  { %487 = vmatpush.msrb.mxu2 %v448_v27  ;;  %508 = vmatpush.msrb.mxu3 %v463_v30 }
 0x126   :  { %v220_v33 = vadd.f32 1e-05, %v217_v32  ;;  %v462_v32 = vld [vmem:[#allocation13 + $0xa0] sm:$0xff] }
 0x127   :  { %488 = vmatpush.msrb.mxu2 %v447_v29  ;;  %509 = vmatpush.msrb.mxu3 %v462_v32 }
 0x128   :  { %557 = vrsqrt.f32 %v220_v33  ;;  %vm227_vm3 = vweird.f32 %v220_v33 }
 0x129   :  { %489 = vmatpush.msrb.mxu2 %v446_v31 }
 0x12e   :  { %v558_v34 = vpop.eup %557 }
 0x12f   :  { %v222_v35 = vmul.f32 %v558_v34, %v220_v33  ;;  %vm228_vm2 = vweird.f32 %v558_v34  ;;  %v445_v33 = vld [vmem:[#allocation13 + $0x18] sm:$0xff] }
 0x130   :  { %vm229_vm4 = vmor %vm227_vm3, %vm228_vm2  ;;  %490 = vmatpush.msrb.mxu2 %v445_v33 }
 0x131   :  { %v223_v36 = vmul.f32 %v558_v34, %v222_v35 }
 0x133   :  { %v224_v37 = vmul.f32 0.5, %v223_v36  ;;  %v444_v36 = vld [vmem:[#allocation13 + $0x10] sm:$0xff] }
 0x134   :  { %491 = vmatpush.msrb.mxu2 %v444_v36 }
 0x135   :  { %v225_v38 = vsub.f32 1.5, %v224_v37  ;;  %v460_v37 = vld [vmem:[#allocation13 + $0x90] sm:$0xff] }
 0x137   :  { %v226_v41 = vmul.f32 %v558_v34, %v225_v38  ;;  %v443_v38 = vld [vmem:[#allocation13 + $0x8] sm:$0xff] }
 0x138   :  { %492 = vmatpush.msrb.mxu2 %v443_v38 }
 0x139   :  { %v230_v46 = vsel %vm229_vm4, %v558_v34, %v226_v41  ;;  %v461_v34 = vld [vmem:[#allocation13 + $0x98] sm:$0xff]  ;;  %v458_v41 = vld [vmem:[#allocation13 + $0x80] sm:$0xff] }
 0x13a   :  { %v231_v47 = vmul.f32 %v230_v46, %v218_v42  ;;  %v232_v49 = vmul.f32 %v230_v46, %v219_v43  ;;  %510 = vmatpush.msrb.mxu3 %v461_v34  ;;  %493 = vmatpush.msrb.mxu2 %v442_v40 }
 0x13c   :  { %v238_v51 = vmul.f32 %v234_v44, %v231_v47  ;;  %v239_v52 = vmul.f32 %v235_v45, %v232_v49  ;;  %511 = vmatpush.msrb.mxu3 %v460_v37 }
 0x13e   :  { %v245_v53 = vadd.f32 %v241_v48, %v238_v51  ;;  %v246_v54 = vadd.f32 %v242_v50, %v239_v52  ;;  %512 = vmatpush.msrb.mxu3 %v459_v39 }
 0x140   :  { %333 = vmatmul.f32.vlgmr.msra.gmra.mxu2 %v245_v53  ;;  %353 = vmatmul.f32.vlgmr.msra.gmra.mxu3 %v246_v54 }
 0x141   :  { %373 = vmatmul.f32.vlgmr.msrb.gmra.mxu0 %v245_v53  ;;  %393 = vmatmul.f32.vlgmr.msrb.gmra.mxu1 %v246_v54  ;;  %v399_v53 = vld [vmem:[%s922_s7] sm:$0x3] }
 0x142   :  { %513 = vmatpush.msrb.mxu3 %v458_v41 }
 0x1be   :  { %v374_v55 = vpop.f32.mrf.mxu0  ;;  %v394_v58 = vpop.f32.mrf.mxu1 }
 0x1bf   :  { %v375_v56 = vadd.f32 %v374_v55, %v314_v13  ;;  %v429_v55 = vperm.slane %v399_v53, 0 }
 0x1c1   :  { %v395_v60 = vadd.f32 %v394_v58, %v375_v56  ;;  %v430_v56 = vperm.slane %v399_v53, 1 }
 0x1c3   :  { %v334_v59 = vpop.f32.mrf.mxu2  ;;  %v354_v62 = vpop.f32.mrf.mxu3  ;;  %v892_v0 = vmax.f32 %v395_v60, 0.0 }
 0x1c4   :  { %v335_v61 = vadd.f32 %v334_v59, %v313_v57  ;;  %v436_v59 = vperm.slane %v400_v12, 0 }
 0x1c5   :  { %v406_v4 = vmul.f32 %v892_v0, %v892_v0 }
 0x1c6   :  { %v355_v63 = vadd.f32 %v354_v62, %v335_v61  ;;  %v437_v61 = vperm.slane %v400_v12, 1 }
 0x1c8   :  { %v894_v1 = vmax.f32 %v355_v63, 0.0 }
 0x1ca   :  { %v401_v2 = vadd.f32 %v892_v0, %v894_v1  ;;  %v405_v3 = vmul.f32 %v894_v1, %v894_v1 }
 0x1cc   :  { %402 = vadd.xlane.f32.xlu1 %v401_v2  ;;  %v407_v5 = vadd.f32 %v406_v4, %v405_v3 }
 0x1d4   :  { %408 = vadd.xlane.f32.xlu1 %v407_v5 }
 0x23f   :  { %v403_v35 = vpop.xlane.xlu1 %402 }
 0x240   :  { %v404_v42 = vmul.f32 %v403_v35, %v880_v21 }
 0x242   :  { %v411_v44 = vmul.f32 %v404_v42, %v404_v42  ;;  %v413_v13 = vsub.f32 %v894_v1, %v404_v42  ;;  %v554_v1 = vld [vmem:[%s925_s10] ss:$0 sm:$0xff] }
 0x247   :  { %v409_v43 = vpop.xlane.xlu1 %408 }
 0x248   :  { %v410_v45 = vmul.f32 %v409_v43, %v880_v21  ;;  %v414_v21 = vsub.f32 %v892_v0, %v404_v42 }
 0x24a   :  { %v412_v46 = vsub.f32 %v410_v45, %v411_v44 }
 0x24c   :  { %v415_v47 = vadd.f32 1e-05, %v412_v46 }
 0x24e   :  { %559 = vrsqrt.f32 %v415_v47  ;;  %vm422_vm6 = vweird.f32 %v415_v47 }
 0x254   :  { %v560_v48 = vpop.eup %559 }
 0x255   :  { %v417_v49 = vmul.f32 %v560_v48, %v415_v47  ;;  %vm423_vm5 = vweird.f32 %v560_v48 }
 0x256   :  { %vm424_vm7 = vmor %vm422_vm6, %vm423_vm5 }
 0x257   :  { %v418_v50 = vmul.f32 %v560_v48, %v417_v49 }
 0x259   :  { %v419_v51 = vmul.f32 0.5, %v418_v50 }
 0x25b   :  { %v420_v52 = vsub.f32 1.5, %v419_v51 }
 0x25d   :  { %v421_v54 = vmul.f32 %v560_v48, %v420_v52 }
 0x25f   :  { %v425_v57 = vsel %vm424_vm7, %v560_v48, %v421_v54 }
 0x260   :  { %v426_v58 = vmul.f32 %v425_v57, %v413_v13  ;;  %v427_v60 = vmul.f32 %v425_v57, %v414_v21 }
 0x262   :  { %v433_v62 = vmul.f32 %v429_v55, %v426_v58  ;;  %v434_v63 = vmul.f32 %v430_v56, %v427_v60 }
 0x264   :  { %v440_v2 = vadd.f32 %v436_v59, %v433_v62  ;;  %v441_v3 = vadd.f32 %v437_v61, %v434_v63 }
 0x266   :  { %494 = vmatmul.f32.vlgmr.msrb.gmra.mxu2 %v440_v2  ;;  %514 = vmatmul.f32.vlgmr.msrb.gmra.mxu3 %v441_v3 }
 0x2e9   :  { %v495_v4 = vpop.f32.mrf.mxu2  ;;  %v515_v5 = vpop.f32.mrf.mxu3 }
 0x2ea   :  { %v496_v0 = vadd.f32 %v554_v1, %v495_v4 }
 0x2ec   :  { %v516_v6 = vadd.f32 %v515_v5, %v496_v0 }
 0x2ee   :  { %518 = vst [vmem:[#allocation14] sm:$0xff] %v516_v6 }
 0x2ef   :  { %529 = dma.vmem_to_hbm [thread:$0]  %s525_s15, 128, %s527_s18, [#allocation4]  }
 0x2f0   :  { %761 = dma.done.wait [#allocation4], 128  }
 0x2f1   :  { %762 = vsyncadd [#allocation4], 4294967168 }
 0x2f2   :  { %534 = vsyncpa [#allocation3], 1 }
 0x2f3   :  { %535 = vsyncpa [#allocation6], 1 }
 0x2f4   :  { %536 = vsyncpa [#allocation9], 1 }
 0x2f5   :  { %537 = vsyncpa [#allocation12], 1 }
 0x2f6   :  { %538 = vsyncpa [#allocation4], 1 }

</bundles_post_ra>
